<compile_context>
chip_gen: v6e
topology: v6e:2x2x1
jax: 0.10.0
libtpu: 0.0.40
codegen_flags: <defaults>
</compile_context>

<pallas_src>
import jax
import jax.numpy as jnp
from jax.experimental import pallas as pl
from jax.experimental.pallas import tpu as pltpu

H = 6  # hidden width

# Offsets into the packed parameter vector (row-major, (in, out) layout).
_W1 = 0            # (2, 6) -> 12
_B1 = _W1 + 2 * H  # (6,)   -> 6
_W2 = _B1 + H      # (6, 6) -> 36
_B2 = _W2 + H * H  # (6,)   -> 6
_W3 = _B2 + H      # (6, 1) -> 6
_B3 = _W3 + H      # (1,)   -> 1
_PARAM_LEN = _B3 + 1  # 67

LANES = 128   # lane width of a vreg
S_MAX = 512   # max sublane rows per grid step -> 65,536 samples / step


def mlp_kernel(p_ref, x_ref, o_ref):
    """p_ref: SMEM (67,) f32 packed params.
    x_ref: VMEM (2, S, 128) f32 -- feature axis leading, batch dense on (S,128).
    o_ref: VMEM (S, 128) f32    -- dense sublane+lane output (batch-major).
    """
    x0 = x_ref[0]  # (S, 128) feature 0
    x1 = x_ref[1]  # (S, 128) feature 1

    def lrelu(a):
        # max-form LeakyReLU: 2 VALU ops, bit-identical to where-form.
        return jnp.maximum(a, 0.01 * a)

    # ---- Layer 1: Linear(2, 6) + LeakyReLU (unrolled VPU MACs) ----
    h1 = []
    for j in range(H):
        a = (x0 * p_ref[_W1 + j]
             + x1 * p_ref[_W1 + H + j]
             + p_ref[_B1 + j])
        h1.append(lrelu(a))

    # ---- Layer 2: Linear(6, 6) + LeakyReLU ----
    h2 = []
    for j in range(H):
        acc = h1[0] * p_ref[_W2 + j] + p_ref[_B2 + j]
        for i in range(1, H):
            acc = acc + h1[i] * p_ref[_W2 + i * H + j]
        h2.append(lrelu(acc))

    # ---- Layer 3: Linear(6, 1) + Sigmoid ----
    z = h2[0] * p_ref[_W3 + 0] + p_ref[_B3]
    for i in range(1, H):
        z = z + h2[i] * p_ref[_W3 + i]

    # sigmoid(z) == 0.5*tanh(0.5*z) + 0.5 : one EUP tanh + 2 VALU ops.
    o_ref[...] = 0.5 * jnp.tanh(0.5 * z) + 0.5


def pack_params(params):
    """Flatten (w1,b1,w2,b2,w3,b3) -> (67,) f32, (in,out) row-major layout."""
    w1, b1, w2, b2, w3, b3 = params
    return jnp.concatenate([
        w1.reshape(-1), b1.reshape(-1),
        w2.reshape(-1), b2.reshape(-1),
        w3.reshape(-1), b3.reshape(-1),
    ]).astype(jnp.float32)


def solution_model_forward(x, params):
    """x: (B, 2) float32 -> (B, 1) float32."""
    x = x.astype(jnp.float32)
    B = x.shape[0]
    packed = pack_params(params)
    assert packed.shape == (_PARAM_LEN,)

    # Batch packed onto (sublane rows, 128 lanes).
    rows = -(-B // LANES)                      # ceil(B / 128)
    rows = max(8, ((rows + 7) // 8) * 8)       # sublane rows, multiple of 8
    s = min(S_MAX, rows)                       # sublane rows per grid step
    R = ((rows + s - 1) // s) * s              # total rows, multiple of s
    b_pad = R * LANES
    grid = (R // s,)

    # Single pad pass + layout reshape -> (2, R, 128), sample k at (row k//128,
    # lane k%128). No zeros+scatter double pass over HBM.
    xp = jnp.pad(x, ((0, b_pad - B), (0, 0)))  # (b_pad, 2)
    xt = xp.T.reshape(2, R, LANES)             # (2, R, 128)

    out = pl.pallas_call(
        mlp_kernel,
        out_shape=jax.ShapeDtypeStruct((R, LANES), jnp.float32),
        grid=grid,
        in_specs=[
            pl.BlockSpec(memory_space=pltpu.MemorySpace.SMEM),    # packed params
            pl.BlockSpec((2, s, LANES), lambda i: (0, i, 0)),     # dense batch tile
        ],
        out_specs=pl.BlockSpec((s, LANES), lambda i: (i, 0)),     # dense output tile
        compiler_params=pltpu.CompilerParams(
            dimension_semantics=("parallel",)),
    )(packed, xt)

    # (R, 128) row-major flatten undoes the packing: index r*128 + c == sample k.
    return out.reshape(b_pad)[:B].reshape(B, 1)


def init_params(key):
    """uniform(-1, +1) init, matching nn.init.uniform_(p, -1, 1).

    Stored as (in, out) / (1, out):
      w1: (2, 6), b1: (1, 6), w2: (6, 6), b2: (1, 6), w3: (6, 1), b3: (1, 1)
    """
    ks = jax.random.split(key, 6)
    u = lambda k, shape: jax.random.uniform(
        k, shape, dtype=jnp.float32, minval=-1.0, maxval=1.0)
    return (u(ks[0], (2, 6)), u(ks[1], (1, 6)),
            u(ks[2], (6, 6)), u(ks[3], (1, 6)),
            u(ks[4], (6, 1)), u(ks[5], (1, 1)))


def reference_forward(x, params):
    """Pure-JAX reference matching the PyTorch semantics."""
    w1, b1, w2, b2, w3, b3 = params
    h = x @ w1 + b1
    h = jnp.where(h > 0, h, 0.01 * h)
    h = h @ w2 + b2
    h = jnp.where(h > 0, h, 0.01 * h)
    return jax.nn.sigmoid(h @ w3 + b3)


if __name__ == "__main__":
    key = jax.random.PRNGKey(0)
    k_params, k_x1, k_x2 = jax.random.split(key, 3)

    params = init_params(k_params)

    # XOR-style inputs: small batch of 2-feature vectors (batch=8).
    B = 8
    x = (jax.random.uniform(k_x1, (B, 2), dtype=jnp.float32) > 0.5).astype(
        jnp.float32)
    out = jax.block_until_ready(solution_model_forward(x, params))
    ref = reference_forward(x, params)
    assert out.shape == (B, 1)
    assert jnp.allclose(out, ref, atol=1e-5, rtol=1e-5), (out, ref)

    # Second check exercising the non-trivial padding path.
    B2 = 1000
    x2 = jax.random.uniform(k_x2, (B2, 2), dtype=jnp.float32)
    out2 = jax.block_until_ready(solution_model_forward(x2, params))
    ref2 = reference_forward(x2, params)
    assert out2.shape == (B2, 1)
    assert jnp.allclose(out2, ref2, atol=1e-5, rtol=1e-5)

    # Third check exercising the multi-step grid path (>= 2 parallel steps).
    B3 = 140_000
    x3 = jax.random.uniform(jax.random.PRNGKey(1), (B3, 2), dtype=jnp.float32)
    out3 = jax.block_until_ready(solution_model_forward(x3, params))
    ref3 = reference_forward(x3, params)
    assert out3.shape == (B3, 1)
    assert jnp.allclose(out3, ref3, atol=1e-5, rtol=1e-5)

    print("KERNEL_OK")
</pallas_src>

<mosaic_0001>
module attributes {stable_mosaic.version = 11 : i64} {
  func.func @mlp_kernel(%arg0: i32, %arg1: memref<67xf32, #tpu.memory_space<smem>>, %arg2: memref<2x8x128xf32, #tpu.memory_space<vmem>>, %arg3: memref<8x128xf32, #tpu.memory_space<vmem>>) attributes {dimension_semantics = [#tpu.dimension_semantics<parallel>], iteration_bounds = array<i64: 1>, scalar_prefetch = 0 : i64, scratch_operands = 0 : i64, tpu.core_type = #tpu.core_type<tc>, window_params = [{transform_indices = @transform_0, window_bounds = array<i64: 67>}, {transform_indices = @transform_1, window_bounds = array<i64: 2, 8, 128>}, {transform_indices = @transform_2, window_bounds = array<i64: 8, 128>}]} {
    %c0 = arith.constant 0 : index
    %c0_0 = arith.constant 0 : index
    %c0_1 = arith.constant 0 : index
    %0 = vector.load %arg2[%c0, %c0_0, %c0_1] : memref<2x8x128xf32, #tpu.memory_space<vmem>>, vector<1x8x128xf32>
    %1 = vector.shape_cast %0 : vector<1x8x128xf32> to vector<8x128xf32>
    %c1 = arith.constant 1 : index
    %c0_2 = arith.constant 0 : index
    %c0_3 = arith.constant 0 : index
    %2 = vector.load %arg2[%c1, %c0_2, %c0_3] : memref<2x8x128xf32, #tpu.memory_space<vmem>>, vector<1x8x128xf32>
    %3 = vector.shape_cast %2 : vector<1x8x128xf32> to vector<8x128xf32>
    %c0_4 = arith.constant 0 : index
    %4 = memref.load %arg1[%c0_4] : memref<67xf32, #tpu.memory_space<smem>>
    %5 = vector.broadcast %4 : f32 to vector<8x128xf32>
    %6 = arith.mulf %1, %5 : vector<8x128xf32>
    %c6 = arith.constant 6 : index
    %7 = memref.load %arg1[%c6] : memref<67xf32, #tpu.memory_space<smem>>
    %8 = vector.broadcast %7 : f32 to vector<8x128xf32>
    %9 = arith.mulf %3, %8 : vector<8x128xf32>
    %10 = arith.addf %6, %9 : vector<8x128xf32>
    %c12 = arith.constant 12 : index
    %11 = memref.load %arg1[%c12] : memref<67xf32, #tpu.memory_space<smem>>
    %12 = vector.broadcast %11 : f32 to vector<8x128xf32>
    %13 = arith.addf %10, %12 : vector<8x128xf32>
    %cst = arith.constant 0.00999999977 : f32
    %14 = vector.broadcast %cst : f32 to vector<8x128xf32>
    %15 = arith.mulf %14, %13 : vector<8x128xf32>
    %16 = arith.maximumf %13, %15 : vector<8x128xf32>
    %c1_5 = arith.constant 1 : index
    %17 = memref.load %arg1[%c1_5] : memref<67xf32, #tpu.memory_space<smem>>
    %18 = vector.broadcast %17 : f32 to vector<8x128xf32>
    %19 = arith.mulf %1, %18 : vector<8x128xf32>
    %c7 = arith.constant 7 : index
    %20 = memref.load %arg1[%c7] : memref<67xf32, #tpu.memory_space<smem>>
    %21 = vector.broadcast %20 : f32 to vector<8x128xf32>
    %22 = arith.mulf %3, %21 : vector<8x128xf32>
    %23 = arith.addf %19, %22 : vector<8x128xf32>
    %c13 = arith.constant 13 : index
    %24 = memref.load %arg1[%c13] : memref<67xf32, #tpu.memory_space<smem>>
    %25 = vector.broadcast %24 : f32 to vector<8x128xf32>
    %26 = arith.addf %23, %25 : vector<8x128xf32>
    %cst_6 = arith.constant 0.00999999977 : f32
    %27 = vector.broadcast %cst_6 : f32 to vector<8x128xf32>
    %28 = arith.mulf %27, %26 : vector<8x128xf32>
    %29 = arith.maximumf %26, %28 : vector<8x128xf32>
    %c2 = arith.constant 2 : index
    %30 = memref.load %arg1[%c2] : memref<67xf32, #tpu.memory_space<smem>>
    %31 = vector.broadcast %30 : f32 to vector<8x128xf32>
    %32 = arith.mulf %1, %31 : vector<8x128xf32>
    %c8 = arith.constant 8 : index
    %33 = memref.load %arg1[%c8] : memref<67xf32, #tpu.memory_space<smem>>
    %34 = vector.broadcast %33 : f32 to vector<8x128xf32>
    %35 = arith.mulf %3, %34 : vector<8x128xf32>
    %36 = arith.addf %32, %35 : vector<8x128xf32>
    %c14 = arith.constant 14 : index
    %37 = memref.load %arg1[%c14] : memref<67xf32, #tpu.memory_space<smem>>
    %38 = vector.broadcast %37 : f32 to vector<8x128xf32>
    %39 = arith.addf %36, %38 : vector<8x128xf32>
    %cst_7 = arith.constant 0.00999999977 : f32
    %40 = vector.broadcast %cst_7 : f32 to vector<8x128xf32>
    %41 = arith.mulf %40, %39 : vector<8x128xf32>
    %42 = arith.maximumf %39, %41 : vector<8x128xf32>
    %c3 = arith.constant 3 : index
    %43 = memref.load %arg1[%c3] : memref<67xf32, #tpu.memory_space<smem>>
    %44 = vector.broadcast %43 : f32 to vector<8x128xf32>
    %45 = arith.mulf %1, %44 : vector<8x128xf32>
    %c9 = arith.constant 9 : index
    %46 = memref.load %arg1[%c9] : memref<67xf32, #tpu.memory_space<smem>>
    %47 = vector.broadcast %46 : f32 to vector<8x128xf32>
    %48 = arith.mulf %3, %47 : vector<8x128xf32>
    %49 = arith.addf %45, %48 : vector<8x128xf32>
    %c15 = arith.constant 15 : index
    %50 = memref.load %arg1[%c15] : memref<67xf32, #tpu.memory_space<smem>>
    %51 = vector.broadcast %50 : f32 to vector<8x128xf32>
    %52 = arith.addf %49, %51 : vector<8x128xf32>
    %cst_8 = arith.constant 0.00999999977 : f32
    %53 = vector.broadcast %cst_8 : f32 to vector<8x128xf32>
    %54 = arith.mulf %53, %52 : vector<8x128xf32>
    %55 = arith.maximumf %52, %54 : vector<8x128xf32>
    %c4 = arith.constant 4 : index
    %56 = memref.load %arg1[%c4] : memref<67xf32, #tpu.memory_space<smem>>
    %57 = vector.broadcast %56 : f32 to vector<8x128xf32>
    %58 = arith.mulf %1, %57 : vector<8x128xf32>
    %c10 = arith.constant 10 : index
    %59 = memref.load %arg1[%c10] : memref<67xf32, #tpu.memory_space<smem>>
    %60 = vector.broadcast %59 : f32 to vector<8x128xf32>
    %61 = arith.mulf %3, %60 : vector<8x128xf32>
    %62 = arith.addf %58, %61 : vector<8x128xf32>
    %c16 = arith.constant 16 : index
    %63 = memref.load %arg1[%c16] : memref<67xf32, #tpu.memory_space<smem>>
    %64 = vector.broadcast %63 : f32 to vector<8x128xf32>
    %65 = arith.addf %62, %64 : vector<8x128xf32>
    %cst_9 = arith.constant 0.00999999977 : f32
    %66 = vector.broadcast %cst_9 : f32 to vector<8x128xf32>
    %67 = arith.mulf %66, %65 : vector<8x128xf32>
    %68 = arith.maximumf %65, %67 : vector<8x128xf32>
    %c5 = arith.constant 5 : index
    %69 = memref.load %arg1[%c5] : memref<67xf32, #tpu.memory_space<smem>>
    %70 = vector.broadcast %69 : f32 to vector<8x128xf32>
    %71 = arith.mulf %1, %70 : vector<8x128xf32>
    %c11 = arith.constant 11 : index
    %72 = memref.load %arg1[%c11] : memref<67xf32, #tpu.memory_space<smem>>
    %73 = vector.broadcast %72 : f32 to vector<8x128xf32>
    %74 = arith.mulf %3, %73 : vector<8x128xf32>
    %75 = arith.addf %71, %74 : vector<8x128xf32>
    %c17 = arith.constant 17 : index
    %76 = memref.load %arg1[%c17] : memref<67xf32, #tpu.memory_space<smem>>
    %77 = vector.broadcast %76 : f32 to vector<8x128xf32>
    %78 = arith.addf %75, %77 : vector<8x128xf32>
    %cst_10 = arith.constant 0.00999999977 : f32
    %79 = vector.broadcast %cst_10 : f32 to vector<8x128xf32>
    %80 = arith.mulf %79, %78 : vector<8x128xf32>
    %81 = arith.maximumf %78, %80 : vector<8x128xf32>
    %c18 = arith.constant 18 : index
    %82 = memref.load %arg1[%c18] : memref<67xf32, #tpu.memory_space<smem>>
    %83 = vector.broadcast %82 : f32 to vector<8x128xf32>
    %84 = arith.mulf %16, %83 : vector<8x128xf32>
    %c54 = arith.constant 54 : index
    %85 = memref.load %arg1[%c54] : memref<67xf32, #tpu.memory_space<smem>>
    %86 = vector.broadcast %85 : f32 to vector<8x128xf32>
    %87 = arith.addf %84, %86 : vector<8x128xf32>
    %c24 = arith.constant 24 : index
    %88 = memref.load %arg1[%c24] : memref<67xf32, #tpu.memory_space<smem>>
    %89 = vector.broadcast %88 : f32 to vector<8x128xf32>
    %90 = arith.mulf %29, %89 : vector<8x128xf32>
    %91 = arith.addf %87, %90 : vector<8x128xf32>
    %c30 = arith.constant 30 : index
    %92 = memref.load %arg1[%c30] : memref<67xf32, #tpu.memory_space<smem>>
    %93 = vector.broadcast %92 : f32 to vector<8x128xf32>
    %94 = arith.mulf %42, %93 : vector<8x128xf32>
    %95 = arith.addf %91, %94 : vector<8x128xf32>
    %c36 = arith.constant 36 : index
    %96 = memref.load %arg1[%c36] : memref<67xf32, #tpu.memory_space<smem>>
    %97 = vector.broadcast %96 : f32 to vector<8x128xf32>
    %98 = arith.mulf %55, %97 : vector<8x128xf32>
    %99 = arith.addf %95, %98 : vector<8x128xf32>
    %c42 = arith.constant 42 : index
    %100 = memref.load %arg1[%c42] : memref<67xf32, #tpu.memory_space<smem>>
    %101 = vector.broadcast %100 : f32 to vector<8x128xf32>
    %102 = arith.mulf %68, %101 : vector<8x128xf32>
    %103 = arith.addf %99, %102 : vector<8x128xf32>
    %c48 = arith.constant 48 : index
    %104 = memref.load %arg1[%c48] : memref<67xf32, #tpu.memory_space<smem>>
    %105 = vector.broadcast %104 : f32 to vector<8x128xf32>
    %106 = arith.mulf %81, %105 : vector<8x128xf32>
    %107 = arith.addf %103, %106 : vector<8x128xf32>
    %cst_11 = arith.constant 0.00999999977 : f32
    %108 = vector.broadcast %cst_11 : f32 to vector<8x128xf32>
    %109 = arith.mulf %108, %107 : vector<8x128xf32>
    %110 = arith.maximumf %107, %109 : vector<8x128xf32>
    %c19 = arith.constant 19 : index
    %111 = memref.load %arg1[%c19] : memref<67xf32, #tpu.memory_space<smem>>
    %112 = vector.broadcast %111 : f32 to vector<8x128xf32>
    %113 = arith.mulf %16, %112 : vector<8x128xf32>
    %c55 = arith.constant 55 : index
    %114 = memref.load %arg1[%c55] : memref<67xf32, #tpu.memory_space<smem>>
    %115 = vector.broadcast %114 : f32 to vector<8x128xf32>
    %116 = arith.addf %113, %115 : vector<8x128xf32>
    %c25 = arith.constant 25 : index
    %117 = memref.load %arg1[%c25] : memref<67xf32, #tpu.memory_space<smem>>
    %118 = vector.broadcast %117 : f32 to vector<8x128xf32>
    %119 = arith.mulf %29, %118 : vector<8x128xf32>
    %120 = arith.addf %116, %119 : vector<8x128xf32>
    %c31 = arith.constant 31 : index
    %121 = memref.load %arg1[%c31] : memref<67xf32, #tpu.memory_space<smem>>
    %122 = vector.broadcast %121 : f32 to vector<8x128xf32>
    %123 = arith.mulf %42, %122 : vector<8x128xf32>
    %124 = arith.addf %120, %123 : vector<8x128xf32>
    %c37 = arith.constant 37 : index
    %125 = memref.load %arg1[%c37] : memref<67xf32, #tpu.memory_space<smem>>
    %126 = vector.broadcast %125 : f32 to vector<8x128xf32>
    %127 = arith.mulf %55, %126 : vector<8x128xf32>
    %128 = arith.addf %124, %127 : vector<8x128xf32>
    %c43 = arith.constant 43 : index
    %129 = memref.load %arg1[%c43] : memref<67xf32, #tpu.memory_space<smem>>
    %130 = vector.broadcast %129 : f32 to vector<8x128xf32>
    %131 = arith.mulf %68, %130 : vector<8x128xf32>
    %132 = arith.addf %128, %131 : vector<8x128xf32>
    %c49 = arith.constant 49 : index
    %133 = memref.load %arg1[%c49] : memref<67xf32, #tpu.memory_space<smem>>
    %134 = vector.broadcast %133 : f32 to vector<8x128xf32>
    %135 = arith.mulf %81, %134 : vector<8x128xf32>
    %136 = arith.addf %132, %135 : vector<8x128xf32>
    %cst_12 = arith.constant 0.00999999977 : f32
    %137 = vector.broadcast %cst_12 : f32 to vector<8x128xf32>
    %138 = arith.mulf %137, %136 : vector<8x128xf32>
    %139 = arith.maximumf %136, %138 : vector<8x128xf32>
    %c20 = arith.constant 20 : index
    %140 = memref.load %arg1[%c20] : memref<67xf32, #tpu.memory_space<smem>>
    %141 = vector.broadcast %140 : f32 to vector<8x128xf32>
    %142 = arith.mulf %16, %141 : vector<8x128xf32>
    %c56 = arith.constant 56 : index
    %143 = memref.load %arg1[%c56] : memref<67xf32, #tpu.memory_space<smem>>
    %144 = vector.broadcast %143 : f32 to vector<8x128xf32>
    %145 = arith.addf %142, %144 : vector<8x128xf32>
    %c26 = arith.constant 26 : index
    %146 = memref.load %arg1[%c26] : memref<67xf32, #tpu.memory_space<smem>>
    %147 = vector.broadcast %146 : f32 to vector<8x128xf32>
    %148 = arith.mulf %29, %147 : vector<8x128xf32>
    %149 = arith.addf %145, %148 : vector<8x128xf32>
    %c32 = arith.constant 32 : index
    %150 = memref.load %arg1[%c32] : memref<67xf32, #tpu.memory_space<smem>>
    %151 = vector.broadcast %150 : f32 to vector<8x128xf32>
    %152 = arith.mulf %42, %151 : vector<8x128xf32>
    %153 = arith.addf %149, %152 : vector<8x128xf32>
    %c38 = arith.constant 38 : index
    %154 = memref.load %arg1[%c38] : memref<67xf32, #tpu.memory_space<smem>>
    %155 = vector.broadcast %154 : f32 to vector<8x128xf32>
    %156 = arith.mulf %55, %155 : vector<8x128xf32>
    %157 = arith.addf %153, %156 : vector<8x128xf32>
    %c44 = arith.constant 44 : index
    %158 = memref.load %arg1[%c44] : memref<67xf32, #tpu.memory_space<smem>>
    %159 = vector.broadcast %158 : f32 to vector<8x128xf32>
    %160 = arith.mulf %68, %159 : vector<8x128xf32>
    %161 = arith.addf %157, %160 : vector<8x128xf32>
    %c50 = arith.constant 50 : index
    %162 = memref.load %arg1[%c50] : memref<67xf32, #tpu.memory_space<smem>>
    %163 = vector.broadcast %162 : f32 to vector<8x128xf32>
    %164 = arith.mulf %81, %163 : vector<8x128xf32>
    %165 = arith.addf %161, %164 : vector<8x128xf32>
    %cst_13 = arith.constant 0.00999999977 : f32
    %166 = vector.broadcast %cst_13 : f32 to vector<8x128xf32>
    %167 = arith.mulf %166, %165 : vector<8x128xf32>
    %168 = arith.maximumf %165, %167 : vector<8x128xf32>
    %c21 = arith.constant 21 : index
    %169 = memref.load %arg1[%c21] : memref<67xf32, #tpu.memory_space<smem>>
    %170 = vector.broadcast %169 : f32 to vector<8x128xf32>
    %171 = arith.mulf %16, %170 : vector<8x128xf32>
    %c57 = arith.constant 57 : index
    %172 = memref.load %arg1[%c57] : memref<67xf32, #tpu.memory_space<smem>>
    %173 = vector.broadcast %172 : f32 to vector<8x128xf32>
    %174 = arith.addf %171, %173 : vector<8x128xf32>
    %c27 = arith.constant 27 : index
    %175 = memref.load %arg1[%c27] : memref<67xf32, #tpu.memory_space<smem>>
    %176 = vector.broadcast %175 : f32 to vector<8x128xf32>
    %177 = arith.mulf %29, %176 : vector<8x128xf32>
    %178 = arith.addf %174, %177 : vector<8x128xf32>
    %c33 = arith.constant 33 : index
    %179 = memref.load %arg1[%c33] : memref<67xf32, #tpu.memory_space<smem>>
    %180 = vector.broadcast %179 : f32 to vector<8x128xf32>
    %181 = arith.mulf %42, %180 : vector<8x128xf32>
    %182 = arith.addf %178, %181 : vector<8x128xf32>
    %c39 = arith.constant 39 : index
    %183 = memref.load %arg1[%c39] : memref<67xf32, #tpu.memory_space<smem>>
    %184 = vector.broadcast %183 : f32 to vector<8x128xf32>
    %185 = arith.mulf %55, %184 : vector<8x128xf32>
    %186 = arith.addf %182, %185 : vector<8x128xf32>
    %c45 = arith.constant 45 : index
    %187 = memref.load %arg1[%c45] : memref<67xf32, #tpu.memory_space<smem>>
    %188 = vector.broadcast %187 : f32 to vector<8x128xf32>
    %189 = arith.mulf %68, %188 : vector<8x128xf32>
    %190 = arith.addf %186, %189 : vector<8x128xf32>
    %c51 = arith.constant 51 : index
    %191 = memref.load %arg1[%c51] : memref<67xf32, #tpu.memory_space<smem>>
    %192 = vector.broadcast %191 : f32 to vector<8x128xf32>
    %193 = arith.mulf %81, %192 : vector<8x128xf32>
    %194 = arith.addf %190, %193 : vector<8x128xf32>
    %cst_14 = arith.constant 0.00999999977 : f32
    %195 = vector.broadcast %cst_14 : f32 to vector<8x128xf32>
    %196 = arith.mulf %195, %194 : vector<8x128xf32>
    %197 = arith.maximumf %194, %196 : vector<8x128xf32>
    %c22 = arith.constant 22 : index
    %198 = memref.load %arg1[%c22] : memref<67xf32, #tpu.memory_space<smem>>
    %199 = vector.broadcast %198 : f32 to vector<8x128xf32>
    %200 = arith.mulf %16, %199 : vector<8x128xf32>
    %c58 = arith.constant 58 : index
    %201 = memref.load %arg1[%c58] : memref<67xf32, #tpu.memory_space<smem>>
    %202 = vector.broadcast %201 : f32 to vector<8x128xf32>
    %203 = arith.addf %200, %202 : vector<8x128xf32>
    %c28 = arith.constant 28 : index
    %204 = memref.load %arg1[%c28] : memref<67xf32, #tpu.memory_space<smem>>
    %205 = vector.broadcast %204 : f32 to vector<8x128xf32>
    %206 = arith.mulf %29, %205 : vector<8x128xf32>
    %207 = arith.addf %203, %206 : vector<8x128xf32>
    %c34 = arith.constant 34 : index
    %208 = memref.load %arg1[%c34] : memref<67xf32, #tpu.memory_space<smem>>
    %209 = vector.broadcast %208 : f32 to vector<8x128xf32>
    %210 = arith.mulf %42, %209 : vector<8x128xf32>
    %211 = arith.addf %207, %210 : vector<8x128xf32>
    %c40 = arith.constant 40 : index
    %212 = memref.load %arg1[%c40] : memref<67xf32, #tpu.memory_space<smem>>
    %213 = vector.broadcast %212 : f32 to vector<8x128xf32>
    %214 = arith.mulf %55, %213 : vector<8x128xf32>
    %215 = arith.addf %211, %214 : vector<8x128xf32>
    %c46 = arith.constant 46 : index
    %216 = memref.load %arg1[%c46] : memref<67xf32, #tpu.memory_space<smem>>
    %217 = vector.broadcast %216 : f32 to vector<8x128xf32>
    %218 = arith.mulf %68, %217 : vector<8x128xf32>
    %219 = arith.addf %215, %218 : vector<8x128xf32>
    %c52 = arith.constant 52 : index
    %220 = memref.load %arg1[%c52] : memref<67xf32, #tpu.memory_space<smem>>
    %221 = vector.broadcast %220 : f32 to vector<8x128xf32>
    %222 = arith.mulf %81, %221 : vector<8x128xf32>
    %223 = arith.addf %219, %222 : vector<8x128xf32>
    %cst_15 = arith.constant 0.00999999977 : f32
    %224 = vector.broadcast %cst_15 : f32 to vector<8x128xf32>
    %225 = arith.mulf %224, %223 : vector<8x128xf32>
    %226 = arith.maximumf %223, %225 : vector<8x128xf32>
    %c23 = arith.constant 23 : index
    %227 = memref.load %arg1[%c23] : memref<67xf32, #tpu.memory_space<smem>>
    %228 = vector.broadcast %227 : f32 to vector<8x128xf32>
    %229 = arith.mulf %16, %228 : vector<8x128xf32>
    %c59 = arith.constant 59 : index
    %230 = memref.load %arg1[%c59] : memref<67xf32, #tpu.memory_space<smem>>
    %231 = vector.broadcast %230 : f32 to vector<8x128xf32>
    %232 = arith.addf %229, %231 : vector<8x128xf32>
    %c29 = arith.constant 29 : index
    %233 = memref.load %arg1[%c29] : memref<67xf32, #tpu.memory_space<smem>>
    %234 = vector.broadcast %233 : f32 to vector<8x128xf32>
    %235 = arith.mulf %29, %234 : vector<8x128xf32>
    %236 = arith.addf %232, %235 : vector<8x128xf32>
    %c35 = arith.constant 35 : index
    %237 = memref.load %arg1[%c35] : memref<67xf32, #tpu.memory_space<smem>>
    %238 = vector.broadcast %237 : f32 to vector<8x128xf32>
    %239 = arith.mulf %42, %238 : vector<8x128xf32>
    %240 = arith.addf %236, %239 : vector<8x128xf32>
    %c41 = arith.constant 41 : index
    %241 = memref.load %arg1[%c41] : memref<67xf32, #tpu.memory_space<smem>>
    %242 = vector.broadcast %241 : f32 to vector<8x128xf32>
    %243 = arith.mulf %55, %242 : vector<8x128xf32>
    %244 = arith.addf %240, %243 : vector<8x128xf32>
    %c47 = arith.constant 47 : index
    %245 = memref.load %arg1[%c47] : memref<67xf32, #tpu.memory_space<smem>>
    %246 = vector.broadcast %245 : f32 to vector<8x128xf32>
    %247 = arith.mulf %68, %246 : vector<8x128xf32>
    %248 = arith.addf %244, %247 : vector<8x128xf32>
    %c53 = arith.constant 53 : index
    %249 = memref.load %arg1[%c53] : memref<67xf32, #tpu.memory_space<smem>>
    %250 = vector.broadcast %249 : f32 to vector<8x128xf32>
    %251 = arith.mulf %81, %250 : vector<8x128xf32>
    %252 = arith.addf %248, %251 : vector<8x128xf32>
    %cst_16 = arith.constant 0.00999999977 : f32
    %253 = vector.broadcast %cst_16 : f32 to vector<8x128xf32>
    %254 = arith.mulf %253, %252 : vector<8x128xf32>
    %255 = arith.maximumf %252, %254 : vector<8x128xf32>
    %c60 = arith.constant 60 : index
    %256 = memref.load %arg1[%c60] : memref<67xf32, #tpu.memory_space<smem>>
    %257 = vector.broadcast %256 : f32 to vector<8x128xf32>
    %258 = arith.mulf %110, %257 : vector<8x128xf32>
    %c66 = arith.constant 66 : index
    %259 = memref.load %arg1[%c66] : memref<67xf32, #tpu.memory_space<smem>>
    %260 = vector.broadcast %259 : f32 to vector<8x128xf32>
    %261 = arith.addf %258, %260 : vector<8x128xf32>
    %c61 = arith.constant 61 : index
    %262 = memref.load %arg1[%c61] : memref<67xf32, #tpu.memory_space<smem>>
    %263 = vector.broadcast %262 : f32 to vector<8x128xf32>
    %264 = arith.mulf %139, %263 : vector<8x128xf32>
    %265 = arith.addf %261, %264 : vector<8x128xf32>
    %c62 = arith.constant 62 : index
    %266 = memref.load %arg1[%c62] : memref<67xf32, #tpu.memory_space<smem>>
    %267 = vector.broadcast %266 : f32 to vector<8x128xf32>
    %268 = arith.mulf %168, %267 : vector<8x128xf32>
    %269 = arith.addf %265, %268 : vector<8x128xf32>
    %c63 = arith.constant 63 : index
    %270 = memref.load %arg1[%c63] : memref<67xf32, #tpu.memory_space<smem>>
    %271 = vector.broadcast %270 : f32 to vector<8x128xf32>
    %272 = arith.mulf %197, %271 : vector<8x128xf32>
    %273 = arith.addf %269, %272 : vector<8x128xf32>
    %c64 = arith.constant 64 : index
    %274 = memref.load %arg1[%c64] : memref<67xf32, #tpu.memory_space<smem>>
    %275 = vector.broadcast %274 : f32 to vector<8x128xf32>
    %276 = arith.mulf %226, %275 : vector<8x128xf32>
    %277 = arith.addf %273, %276 : vector<8x128xf32>
    %c65 = arith.constant 65 : index
    %278 = memref.load %arg1[%c65] : memref<67xf32, #tpu.memory_space<smem>>
    %279 = vector.broadcast %278 : f32 to vector<8x128xf32>
    %280 = arith.mulf %255, %279 : vector<8x128xf32>
    %281 = arith.addf %277, %280 : vector<8x128xf32>
    %cst_17 = arith.constant 5.000000e-01 : f32
    %282 = vector.broadcast %cst_17 : f32 to vector<8x128xf32>
    %283 = arith.mulf %282, %281 : vector<8x128xf32>
    %284 = math.tanh %283 : vector<8x128xf32>
    %cst_18 = arith.constant 5.000000e-01 : f32
    %285 = vector.broadcast %cst_18 : f32 to vector<8x128xf32>
    %286 = arith.mulf %285, %284 : vector<8x128xf32>
    %cst_19 = arith.constant 5.000000e-01 : f32
    %287 = vector.broadcast %cst_19 : f32 to vector<8x128xf32>
    %288 = arith.addf %286, %287 : vector<8x128xf32>
    %c0_20 = arith.constant 0 : index
    %c0_21 = arith.constant 0 : index
    %289 = vector.load %arg3[%c0_20, %c0_21] : memref<8x128xf32, #tpu.memory_space<vmem>>, vector<8x128xf32>
    tpu.vector_store %arg3[%c0_20, %c0_21], %288 {strides = array<i32>} : memref<8x128xf32, #tpu.memory_space<vmem>>, vector<8x128xf32>,
    return
  }
  func.func @transform_0(%arg0: i32) -> i32 {
    %c0_i32 = arith.constant 0 : i32
    %c0_i32_0 = arith.constant 0 : i32
    return %c0_i32 : i32
  }
  func.func @transform_1(%arg0: i32) -> (i32, i32, i32) {
    %c0_i32 = arith.constant 0 : i32
    %c0_i32_0 = arith.constant 0 : i32
    %c0_i32_1 = arith.constant 0 : i32
    return %c0_i32, %arg0, %c0_i32_0 : i32, i32, i32
  }
  func.func @transform_2(%arg0: i32) -> (i32, i32) {
    %c0_i32 = arith.constant 0 : i32
    %c0_i32_0 = arith.constant 0 : i32
    return %arg0, %c0_i32 : i32, i32
  }
}

</mosaic_0001>

<bundles_post_ra>
// kernel: tpu_custom_call.1
= control target key start
LH: loop header
LB: loop body
LE: loop exit
PB: predicated region body
PF: predicated region fallthrough
CT: control target
= control target key end

     0   :  { %7 = vsyncpa [#allocation5], 0  ;;  %s665_s0 = inlined_call_operand.hbm [shape: f32[67], index: 0, kind: input, shape index: {}]   ;;  %s666_s1 = inlined_call_operand.hbm [shape: f32[2,8,128], index: 1, kind: input, shape index: {}]   ;;  %s667_s2 = inlined_call_operand.hbm [shape: f32[8,128], index: 2, kind: output, shape index: {}]  }
   0x1   :  { %8 = vsyncpa [#allocation3], 0 }
   0x2   :  { %9 = vsyncpa [#allocation4], 0  ;;  %s454_s9 = smov [#allocation2]   ;;  %s455_s12 = smov [#allocation6]  }
   0x3   :  { %17 = dma.hbm_to_smem %s665_s0, 16, %s454_s9, [#allocation5]  }
   0x4   :  { %s23_s13 = sshll.u32 %s455_s12, 4  ;;  %s24_s13 = int_to_ptr.vmem [resolvable:$true] %s23_s13 }
   0x5   :  { %s416_s14 = scalar_lea.vmem %s24_s13, 256  ;;  %p421_p1 = scmp.lt.s32.totalorder %s24_s13, %s24_s13 }
   0x6   :  { %p417_p0 = scmp.ne.s32.totalorder %s24_s13, %s416_s14  ;;  %p422_p2 = scmp.lt.s32.totalorder %s416_s14, %s416_s14 }
   0x8   :  { %p423_p3 = por %p422_p2, %p421_p1 }
   0xa   :  { %p424_p4 = pnand %p423_p3, %p417_p0 }
   0xc   :  { %427 = shalt.err (!%p424_p4)
}
   0xd   :  { %s456_s15 = smov 128   ;;  %s457_s16 = smov 8  }
   0xe   :  { %29 = dma.hbm_to_vmem [thread:$0]  %s666_s1, 256, %s24_s13, [#allocation3], %s456_s15, %s456_s15, %s457_s16  }
   0xf   :  { %448 = dma.done.wait [#allocation5], 16  }
  0x10   :  { %449 = vsyncadd [#allocation5], 4294967280 }
  0x11   :  { %450 = dma.done.wait [#allocation3], 256  }
  0x12   :  { %451 = vsyncadd [#allocation3], 4294967040 }
  0x13   :  { %36 = sfence }
  0x14   :  { %s40_s0 = sld [smem:[#allocation2]]  ;;  %v480_v0 = vld [vmem:[#allocation6] sm:$0xff]  ;;  %v482_v1 = vld [vmem:[#allocation6 + $0x8] sm:$0xff] }
  0x15   :  { %s327_s19 = sld [smem:[#allocation2 + $0x6]] }
  0x16   :  { %s328_s20 = sld [smem:[#allocation2 + $0xc]] }
  0x17   :  { %s329_s21 = sld [smem:[#allocation2 + $0x1]] }
  0x18   :  { %s330_s22 = sld [smem:[#allocation2 + $0x7]] }
  0x19   :  { %s484_s23 = sld [smem:[#allocation2 + $0xd]] }
  0x1a   :  { %v41_v2 = vstv %s40_s0  ;;  %s332_s24 = sld [smem:[#allocation2 + $0x2]] }
  0x1b   :  { %v42_v3 = vmul.f32 %v41_v2, %v480_v0  ;;  %v44_v4 = vstv %s327_s19  ;;  %s333_s1 = sld [smem:[#allocation2 + $0x8]] }
  0x1c   :  { %v45_v5 = vmul.f32 %v44_v4, %v482_v1  ;;  %s488_s25 = sld [smem:[#allocation2 + $0xe]]  ;;  %v48_v9 = vstv %s328_s20 }
  0x1d   :  { %v53_v6 = vstv %s329_s21  ;;  %s335_s26 = sld [smem:[#allocation2 + $0x3]] }
  0x1e   :  { %v46_v7 = vadd.f32 %v45_v5, %v42_v3  ;;  %v56_v8 = vstv %s330_s22  ;;  %s336_s27 = sld [smem:[#allocation2 + $0x9]]  ;;  %v54_v10 = vmul.f32 %v53_v6, %v480_v0 }
  0x1f   :  { %v57_v11 = vmul.f32 %v56_v8, %v482_v1  ;;  %s492_s28 = sld [smem:[#allocation2 + $0xf]]  ;;  %v60_v19 = vstv %s484_s23 }
  0x20   :  { %v65_v12 = vstv %s332_s24  ;;  %s338_s29 = sld [smem:[#allocation2 + $0x4]]  ;;  %v49_v15 = vadd.f32 %v48_v9, %v46_v7 }
  0x21   :  { %v66_v13 = vmul.f32 %v65_v12, %v480_v0  ;;  %v68_v14 = vstv %s333_s1  ;;  %s339_s30 = sld [smem:[#allocation2 + $0xa]]  ;;  %v58_v17 = vadd.f32 %v57_v11, %v54_v10 }
  0x22   :  { %v69_v16 = vmul.f32 %v68_v14, %v482_v1  ;;  %s496_s3 = sld [smem:[#allocation2 + $0x10]]  ;;  %v50_v22 = vmul.f32 0.01, %v49_v15  ;;  %v72_v23 = vstv %s488_s25 }
  0x23   :  { %v77_v18 = vstv %s335_s26  ;;  %s498_s4 = sld [smem:[#allocation2 + $0x5]]  ;;  %v61_v26 = vadd.f32 %v60_v19, %v58_v17 }
  0x24   :  { %v80_v20 = vstv %s336_s27  ;;  %s501_s5 = sld [smem:[#allocation2 + $0xb]]  ;;  %v70_v21 = vadd.f32 %v69_v16, %v66_v13  ;;  %v78_v24 = vmul.f32 %v77_v18, %v480_v0  ;;  %v514_v30 = vmax.f32 %v49_v15, %v50_v22 }
  0x25   :  { %s503_s6 = sld [smem:[#allocation2 + $0x11]]  ;;  %v81_v25 = vmul.f32 %v80_v20, %v482_v1  ;;  %v62_v34 = vmul.f32 0.01, %v61_v26  ;;  %v84_v35 = vstv %s492_s28 }
  0x26   :  { %s344_s7 = sld [smem:[#allocation2 + $0x12]]  ;;  %v89_v27 = vstv %s338_s29  ;;  %v73_v29 = vadd.f32 %v72_v23, %v70_v21 }
  0x27   :  { %v92_v28 = vstv %s339_s30  ;;  %s508_s8 = sld [smem:[#allocation2 + $0x36]]  ;;  %v82_v31 = vadd.f32 %v81_v25, %v78_v24  ;;  %v90_v32 = vmul.f32 %v89_v27, %v480_v0  ;;  %v531_v44 = vmax.f32 %v61_v26, %v62_v34 }
  0x28   :  { %s510_s9 = sld [smem:[#allocation2 + $0x18]]  ;;  %v93_v33 = vmul.f32 %v92_v28, %v482_v1  ;;  %v74_v39 = vmul.f32 0.01, %v73_v29  ;;  %v96_v45 = vstv %s496_s3 }
  0x29   :  { %s512_s10 = sld [smem:[#allocation2 + $0x1e]]  ;;  %v101_v36 = vstv %s498_s4  ;;  %v85_v40 = vadd.f32 %v84_v35, %v82_v31 }
  0x2a   :  { %s518_s11 = sld [smem:[#allocation2 + $0x24]]  ;;  %v104_v37 = vstv %s501_s5  ;;  %v94_v41 = vadd.f32 %v93_v33, %v90_v32  ;;  %v102_v42 = vmul.f32 %v101_v36, %v480_v0  ;;  %v543_v49 = vmax.f32 %v73_v29, %v74_v39 }
  0x2b   :  { %s523_s12 = sld [smem:[#allocation2 + $0x2a]]  ;;  %v105_v43 = vmul.f32 %v104_v37, %v482_v1  ;;  %v86_v50 = vmul.f32 0.01, %v85_v40  ;;  %v108_v53 = vstv %s503_s6 }
  0x2c   :  { %v113_v38 = vstv %s344_s7  ;;  %s525_s13 = sld [smem:[#allocation2 + $0x30]]  ;;  %v97_v51 = vadd.f32 %v96_v45, %v94_v41 }
  0x2d   :  { %s351_s14 = sld [smem:[#allocation2 + $0x13]]  ;;  %v114_v46 = vmul.f32 %v113_v38, %v514_v30  ;;  %v116_v47 = vstv %s508_s8  ;;  %v106_v52 = vadd.f32 %v105_v43, %v102_v42  ;;  %v555_v63 = vmax.f32 %v85_v40, %v86_v50 }
  0x2e   :  { %s529_s15 = sld [smem:[#allocation2 + $0x37]]  ;;  %v119_v48 = vstv %s510_s9  ;;  %v98_v59 = vmul.f32 0.01, %v97_v51 }
  0x2f   :  { %s535_s16 = sld [smem:[#allocation2 + $0x19]]  ;;  %v117_v54 = vadd.f32 %v116_v47, %v114_v46  ;;  %v120_v55 = vmul.f32 %v119_v48, %v531_v44  ;;  %v123_v57 = vstv %s512_s10  ;;  %v109_v60 = vadd.f32 %v108_v53, %v106_v52 }
  0x30   :  { %s539_s17 = sld [smem:[#allocation2 + $0x1f]]  ;;  %v124_v1 = vmul.f32 %v123_v57, %v543_v49  ;;  %v127_v2 = vstv %s518_s11  ;;  %v565_v6 = vmax.f32 %v97_v51, %v98_v59 }
  0x31   :  { %s541_s18 = sld [smem:[#allocation2 + $0x25]]  ;;  %v121_v0 = vadd.f32 %v120_v55, %v117_v54  ;;  %v110_v7 = vmul.f32 0.01, %v109_v60  ;;  %v128_v10 = vmul.f32 %v127_v2, %v555_v63  ;;  %v131_v13 = vstv %s523_s12 }
  0x32   :  { %s545_s0 = sld [smem:[#allocation2 + $0x2b]]  ;;  %v132_v25 = vmul.f32 %v131_v13, %v565_v6  ;;  %v135_v27 = vstv %s525_s13 }
  0x33   :  { %v141_v56 = vstv %s351_s14  ;;  %s549_s19 = sld [smem:[#allocation2 + $0x31]]  ;;  %v125_v9 = vadd.f32 %v124_v1, %v121_v0  ;;  %v581_v23 = vmax.f32 %v109_v60, %v110_v7 }
  0x34   :  { %s358_s20 = sld [smem:[#allocation2 + $0x14]]  ;;  %v142_v58 = vmul.f32 %v141_v56, %v514_v30  ;;  %v144_v61 = vstv %s529_s15 }
  0x35   :  { %s359_s21 = sld [smem:[#allocation2 + $0x38]]  ;;  %v147_v62 = vstv %s535_s16  ;;  %v129_v24 = vadd.f32 %v128_v10, %v125_v9  ;;  %v136_v39 = vmul.f32 %v135_v27, %v581_v23 }
  0x36   :  { %s360_s22 = sld [smem:[#allocation2 + $0x1a]]  ;;  %v145_v3 = vadd.f32 %v144_v61, %v142_v58  ;;  %v148_v4 = vmul.f32 %v147_v62, %v531_v44  ;;  %v151_v5 = vstv %s539_s17 }
  0x37   :  { %s361_s23 = sld [smem:[#allocation2 + $0x20]]  ;;  %v152_v14 = vmul.f32 %v151_v5, %v543_v49  ;;  %v155_v20 = vstv %s541_s18  ;;  %v133_v38 = vadd.f32 %v132_v25, %v129_v24 }
  0x38   :  { %s559_s24 = sld [smem:[#allocation2 + $0x26]]  ;;  %v149_v16 = vadd.f32 %v148_v4, %v145_v3  ;;  %v159_v28 = vstv %s545_s0  ;;  %v156_v31 = vmul.f32 %v155_v20, %v555_v63 }
  0x39   :  { %s563_s1 = sld [smem:[#allocation2 + $0x2c]]  ;;  %v160_v40 = vmul.f32 %v159_v28, %v565_v6  ;;  %v163_v42 = vstv %s549_s19  ;;  %v617_v56 = vadd.f32 %v136_v39, %v133_v38 }
  0x3a   :  { %v169_v8 = vstv %s358_s20  ;;  %s567_s25 = sld [smem:[#allocation2 + $0x32]]  ;;  %v153_v29 = vadd.f32 %v152_v14, %v149_v16  ;;  %v164_v0 = vmul.f32 %v163_v42, %v581_v23 }
  0x3b   :  { %v170_v11 = vmul.f32 %v169_v8, %v514_v30  ;;  %v172_v12 = vstv %s359_s21  ;;  %s365_s26 = sld [smem:[#allocation2 + $0x15]] }
  0x3c   :  { %v175_v15 = vstv %s360_s22  ;;  %s573_s27 = sld [smem:[#allocation2 + $0x39]]  ;;  %v157_v47 = vadd.f32 %v156_v31, %v153_v29 }
  0x3d   :  { %v173_v17 = vadd.f32 %v172_v12, %v170_v11  ;;  %v176_v18 = vmul.f32 %v175_v15, %v531_v44  ;;  %v179_v19 = vstv %s361_s23  ;;  %s367_s28 = sld [smem:[#allocation2 + $0x1b]]  ;;  %v138_v12 = vmul.f32 0.01, %v617_v56 }
  0x3e   :  { %v180_v21 = vmul.f32 %v179_v19, %v543_v49  ;;  %v183_v22 = vstv %s559_s24  ;;  %s579_s29 = sld [smem:[#allocation2 + $0x21]]  ;;  %v161_v62 = vadd.f32 %v160_v40, %v157_v47 }
  0x3f   :  { %v177_v26 = vadd.f32 %v176_v18, %v173_v17  ;;  %s584_s30 = sld [smem:[#allocation2 + $0x27]]  ;;  %v184_v32 = vmul.f32 %v183_v22, %v555_v63  ;;  %v187_v35 = vstv %s563_s1  ;;  %v139_v27 = vmax.f32 %v617_v56, %v138_v12  ;;  %s458_s1 = smov [#allocation7]  }
  0x40   :  { %s588_s3 = sld [smem:[#allocation2 + $0x2d]]  ;;  %v188_v48 = vmul.f32 %v187_v35, %v565_v6  ;;  %v191_v57 = vstv %s567_s25  ;;  %v165_v16 = vadd.f32 %v164_v0, %v161_v62  ;;  %s317_s25 = sshll.u32 %s458_s1, 4  ;;  %s318_s25 = int_to_ptr.vmem [resolvable:$true] %s317_s25 }
  0x41   :  { %v197_v33 = vstv %s365_s26  ;;  %s592_s4 = sld [smem:[#allocation2 + $0x33]]  ;;  %v181_v34 = vadd.f32 %v180_v21, %v177_v26  ;;  %v192_v4 = vmul.f32 %v191_v57, %v581_v23  ;;  %s428_s26 = scalar_lea.vmem %s318_s25, 128 }
  0x42   :  { %v198_v36 = vmul.f32 %v197_v33, %v514_v30  ;;  %v200_v37 = vstv %s573_s27  ;;  %s597_s5 = sld [smem:[#allocation2 + $0x16]]  ;;  %v166_v31 = vmul.f32 0.01, %v165_v16  ;;  %p429_p5 = scmp.ne.s32.totalorder %s318_s25, %s428_s26 }
  0x43   :  { %v203_v41 = vstv %s367_s28  ;;  %s601_s6 = sld [smem:[#allocation2 + $0x3a]]  ;;  %v185_v52 = vadd.f32 %v184_v32, %v181_v34  ;;  %p433_p6 = scmp.lt.s32.totalorder %s318_s25, %s318_s25 }
  0x44   :  { %v201_v43 = vadd.f32 %v200_v37, %v198_v36  ;;  %v204_v45 = vmul.f32 %v203_v41, %v531_v44  ;;  %v207_v46 = vstv %s579_s29  ;;  %s606_s7 = sld [smem:[#allocation2 + $0x1c]]  ;;  %p434_p7 = scmp.lt.s32.totalorder %s428_s26, %s428_s26 }
  0x45   :  { %v208_v50 = vmul.f32 %v207_v46, %v543_v49  ;;  %v211_v51 = vstv %s584_s30  ;;  %s611_s8 = sld [smem:[#allocation2 + $0x22]]  ;;  %v189_v3 = vadd.f32 %v188_v48, %v185_v52  ;;  %v167_v46 = vmax.f32 %v165_v16, %v166_v31 }
  0x46   :  { %v205_v53 = vadd.f32 %v204_v45, %v201_v43  ;;  %v212_v54 = vmul.f32 %v211_v51, %v555_v63  ;;  %v215_v55 = vstv %s588_s3  ;;  %s615_s9 = sld [smem:[#allocation2 + $0x28]]  ;;  %p435_p8 = por %p434_p7, %p433_p6 }
  0x47   :  { %s620_s10 = sld [smem:[#allocation2 + $0x2e]]  ;;  %v216_v59 = vmul.f32 %v215_v55, %v565_v6  ;;  %v219_v60 = vstv %s592_s4  ;;  %v193_v20 = vadd.f32 %v192_v4, %v189_v3 }
  0x48   :  { %v209_v58 = vadd.f32 %v208_v50, %v205_v53  ;;  %v225_v61 = vstv %s597_s5  ;;  %s625_s11 = sld [smem:[#allocation2 + $0x34]]  ;;  %v220_v8 = vmul.f32 %v219_v60, %v581_v23  ;;  %p436_p9 = pnand %p435_p8, %p429_p5 }
  0x49   :  { %v226_v1 = vmul.f32 %v225_v61, %v514_v30  ;;  %v228_v2 = vstv %s601_s6  ;;  %s379_s12 = sld [smem:[#allocation2 + $0x17]]  ;;  %v194_v35 = vmul.f32 0.01, %v193_v20 }
  0x4a   :  { %v213_v5 = vadd.f32 %v212_v54, %v209_v58  ;;  %v231_v7 = vstv %s606_s7  ;;  %s632_s13 = sld [smem:[#allocation2 + $0x3b]] }
  0x4b   :  { %v229_v9 = vadd.f32 %v228_v2, %v226_v1  ;;  %v232_v10 = vmul.f32 %v231_v7, %v531_v44  ;;  %v235_v11 = vstv %s611_s8  ;;  %s381_s14 = sld [smem:[#allocation2 + $0x1d]]  ;;  %v195_v50 = vmax.f32 %v193_v20, %v194_v35 }
  0x4c   :  { %v217_v13 = vadd.f32 %v216_v59, %v213_v5  ;;  %v236_v14 = vmul.f32 %v235_v11, %v543_v49  ;;  %v239_v15 = vstv %s615_s9  ;;  %s382_s15 = sld [smem:[#allocation2 + $0x23]] }
  0x4d   :  { %v233_v17 = vadd.f32 %v232_v10, %v229_v9  ;;  %v240_v18 = vmul.f32 %v239_v15, %v555_v63  ;;  %v243_v19 = vstv %s620_s10  ;;  %s383_s16 = sld [smem:[#allocation2 + $0x29]] }
  0x4e   :  { %v247_v21 = vstv %s625_s11  ;;  %s643_s17 = sld [smem:[#allocation2 + $0x2f]]  ;;  %v221_v22 = vadd.f32 %v220_v8, %v217_v13  ;;  %v244_v25 = vmul.f32 %v243_v19, %v565_v6 }
  0x4f   :  { %v237_v24 = vadd.f32 %v236_v14, %v233_v17  ;;  %v253_v26 = vstv %s379_s12  ;;  %s646_s18 = sld [smem:[#allocation2 + $0x35]]  ;;  %v248_v33 = vmul.f32 %v247_v21, %v581_v23 }
  0x50   :  { %v254_v28 = vmul.f32 %v253_v26, %v514_v30  ;;  %v256_v29 = vstv %s632_s13  ;;  %s386_s0 = sld [smem:[#allocation2 + $0x3c]]  ;;  %v222_v39 = vmul.f32 0.01, %v221_v22 }
  0x51   :  { %v241_v32 = vadd.f32 %v240_v18, %v237_v24  ;;  %v259_v34 = vstv %s381_s14  ;;  %s652_s19 = sld [smem:[#allocation2 + $0x42]] }
  0x52   :  { %v257_v36 = vadd.f32 %v256_v29, %v254_v28  ;;  %v260_v37 = vmul.f32 %v259_v34, %v531_v44  ;;  %v263_v38 = vstv %s382_s15  ;;  %s388_s20 = sld [smem:[#allocation2 + $0x3d]]  ;;  %v223_v53 = vmax.f32 %v221_v22, %v222_v39 }
  0x53   :  { %v245_v40 = vadd.f32 %v244_v25, %v241_v32  ;;  %v264_v30 = vmul.f32 %v263_v38, %v543_v49  ;;  %v267_v41 = vstv %s383_s16  ;;  %s389_s21 = sld [smem:[#allocation2 + $0x3e]] }
  0x54   :  { %v261_v42 = vadd.f32 %v260_v37, %v257_v36  ;;  %v268_v43 = vmul.f32 %v267_v41, %v555_v63  ;;  %v271_v45 = vstv %s643_s17  ;;  %s390_s22 = sld [smem:[#allocation2 + $0x3f]] }
  0x55   :  { %v249_v47 = vadd.f32 %v248_v33, %v245_v40  ;;  %v275_v48 = vstv %s646_s18  ;;  %s391_s23 = sld [smem:[#allocation2 + $0x40]]  ;;  %v272_v51 = vmul.f32 %v271_v45, %v565_v6 }
  0x56   :  { %v265_v44 = vadd.f32 %v264_v30, %v261_v42  ;;  %v281_v52 = vstv %s386_s0  ;;  %s392_s24 = sld [smem:[#allocation2 + $0x41]]  ;;  %v276_v57 = vmul.f32 %v275_v48, %v581_v23 }
  0x57   :  { %v250_v54 = vmul.f32 0.01, %v249_v47  ;;  %v282_v49 = vmul.f32 %v281_v52, %v139_v27  ;;  %v284_v55 = vstv %s652_s19 }
  0x58   :  { %v269_v56 = vadd.f32 %v268_v43, %v265_v44  ;;  %v287_v63 = vstv %s388_s20 }
  0x59   :  { %v251_v58 = vmax.f32 %v249_v47, %v250_v54  ;;  %v285_v59 = vadd.f32 %v284_v55, %v282_v49  ;;  %v288_v60 = vmul.f32 %v287_v63, %v167_v46  ;;  %v291_v61 = vstv %s389_s21 }
  0x5a   :  { %v273_v62 = vadd.f32 %v272_v51, %v269_v56  ;;  %v292_v0 = vmul.f32 %v291_v61, %v195_v50  ;;  %v295_v1 = vstv %s390_s22 }
  0x5b   :  { %v289_v2 = vadd.f32 %v288_v60, %v285_v59  ;;  %v296_v3 = vmul.f32 %v295_v1, %v223_v53  ;;  %v299_v6 = vstv %s391_s23 }
  0x5c   :  { %v277_v4 = vadd.f32 %v276_v57, %v273_v62  ;;  %v300_v7 = vmul.f32 %v299_v6, %v251_v58  ;;  %v303_v10 = vstv %s392_s24 }
  0x5d   :  { %v293_v5 = vadd.f32 %v292_v0, %v289_v2 }
  0x5e   :  { %v278_v8 = vmul.f32 0.01, %v277_v4 }
  0x5f   :  { %v297_v9 = vadd.f32 %v296_v3, %v293_v5 }
  0x60   :  { %v279_v11 = vmax.f32 %v277_v4, %v278_v8 }
  0x61   :  { %v301_v12 = vadd.f32 %v300_v7, %v297_v9 }
  0x62   :  { %v304_v23 = vmul.f32 %v303_v10, %v279_v11 }
  0x64   :  { %v305_v13 = vadd.f32 %v304_v23, %v301_v12 }
  0x66   :  { %v306_v14 = vmul.f32 0.5, %v305_v13 }
  0x68   :  { %398 = vtanh.f32 %v306_v14 }
  0x75   :  { %v399_v15 = vpop.eup %398 }
  0x76   :  { %v308_v16 = vmul.f32 0.5, %v399_v15 }
  0x78   :  { %v309_v17 = vadd.f32 0.5, %v308_v16 }
  0x7a   :  { %310 = vst [vmem:[#allocation7] sm:$0xff] %v309_v17 }
  0x7b   :  { %439 = shalt.err (!%p436_p9)
}
  0x7c   :  { %320 = dma.vmem_to_hbm [thread:$0]  %s318_s25, 128, %s667_s2, [#allocation4]  }
  0x7d   :  { %452 = dma.done.wait [#allocation4], 128  }
  0x7e   :  { %453 = vsyncadd [#allocation4], 4294967168 }
  0x7f   :  { %324 = vsyncpa [#allocation3], 1 }
  0x80   :  { %325 = vsyncpa [#allocation4], 1 }
  0x81   :  { %326 = vsyncpa [#allocation5], 1 }

</bundles_post_ra>
